<compile_context>
chip_gen: v6e
topology: v6e:2x2x1
jax: 0.10.0
libtpu: 0.0.40
codegen_flags: <defaults>
</compile_context>

<pallas_src>
import jax
import jax.numpy as jnp
from jax import lax
from jax.experimental import pallas as pl
from jax.experimental.pallas import tpu as pltpu


# ---------------------------------------------------------------------------
# Helpers
# ---------------------------------------------------------------------------
def _round_up(x, m):
    return ((x + m - 1) // m) * m


def _pick_row_tile(h8, bytes_per_row, budget=6 * 1024 * 1024):
    """Largest multiple-of-8 divisor of h8 whose working set fits the budget."""
    divs = [d for d in range(8, h8 + 1, 8) if h8 % d == 0]
    fit = [d for d in divs if d * bytes_per_row <= budget]
    return max(fit) if fit else min(divs)


# ---------------------------------------------------------------------------
# Kernels
# ---------------------------------------------------------------------------
def _deconv_kernel(xm_ref, xh_ref, w_ref, b_ref, out_ref):
    # xm_ref : (1, C, TH, Wp)   input row-slab (NCHW), Wp = W + 1 (zero col W)
    # xh_ref : (1, C, 8, Wp)    halo slab; row 0 is the row just below the slab
    # w_ref  : (4, C, 4*Cout)   per-tap weight blocks, cols ordered p*Cout + d
    #                           (p = 2*r + s = output sub-pixel phase)
    # b_ref  : (1, 4*Cout)      bias replicated per phase
    # out_ref: (1, Cout, TH, 4*W)  row-major == NCHW (Cout, 2*TH, 2*W)
    C = xm_ref.shape[1]
    TH = xm_ref.shape[2]
    Wp = xm_ref.shape[3]
    W = Wp - 1
    Cout = out_ref.shape[1]

    bias = b_ref[...]            # (1, 4*Cout)
    wt0 = w_ref[0]               # tap (dr=0, db=0)
    wt1 = w_ref[1]               # tap (dr=0, db=1)
    wt2 = w_ref[2]               # tap (dr=1, db=0)
    wt3 = w_ref[3]               # tap (dr=1, db=1)

    def do_row(a, row_a, row_a1):
        # row_a, row_a1: (C, Wp) input rows a and a+1 (channel-major)
        ra = row_a.T             # (Wp, C)  channels on lanes for the matmul
        ra1 = row_a1.T
        x00 = ra[0:W, :]         # x[a,   b    ]
        x01 = ra[1:W + 1, :]     # x[a,   b + 1]
        x10 = ra1[0:W, :]        # x[a+1, b    ]
        x11 = ra1[1:W + 1, :]    # x[a+1, b + 1]

        yt = jnp.dot(x00, wt0, preferred_element_type=jnp.float32)
        yt = yt + jnp.dot(x01, wt1, preferred_element_type=jnp.float32)
        yt = yt + jnp.dot(x10, wt2, preferred_element_type=jnp.float32)
        yt = yt + jnp.dot(x11, wt3, preferred_element_type=jnp.float32)
        yt = yt + bias           # (W, 4*Cout), col = (2*r + s) * Cout + d

        for r in range(2):       # static: output row parity
            s0 = yt[:, (2 * r) * Cout:(2 * r + 1) * Cout]       # (W, Cout)
            s1 = yt[:, (2 * r + 1) * Cout:(2 * r + 2) * Cout]   # (W, Cout)
            # interleave columns: z[2b + s, d] = s_{s}[b, d]
            z = jnp.stack([s0, s1], axis=1).reshape(2 * W, Cout)
            out_ref[0, :, a, r * 2 * W:(r + 1) * 2 * W] = (
                z.T.astype(out_ref.dtype))                       # (Cout, 2W)

    def body(a, carry):
        do_row(a, xm_ref[0, :, a, :], xm_ref[0, :, a + 1, :])
        return carry

    lax.fori_loop(0, TH - 1, body, 0)
    # last row of the slab uses the halo row as its "a + 1" neighbor
    do_row(TH - 1, xm_ref[0, :, TH - 1, :], xh_ref[0, :, 0, :])


def _nearest_kernel(x_ref, out_ref):
    # x_ref  : (1, C, TH, W)
    # out_ref: (1, C, TH, 4*W)   row-major == NCHW (C, 2*TH, 2*W)
    C = x_ref.shape[1]
    TH = x_ref.shape[2]
    W = x_ref.shape[3]

    def do_row(a):
        xr = x_ref[0, :, a, :]                                    # (C, W)
        xt = xr.T                                                 # (W, C)
        rep = jnp.broadcast_to(xt[:, None, :], (W, 2, C)).reshape(2 * W, C)
        half = rep.T.astype(out_ref.dtype)                        # (C, 2W)
        out_ref[0, :, a, 0:2 * W] = half                          # row 2a
        out_ref[0, :, a, 2 * W:4 * W] = half                      # row 2a + 1

    def body(a, carry):
        do_row(a)
        return carry

    lax.fori_loop(0, TH, body, 0)


# ---------------------------------------------------------------------------
# Wrappers
# ---------------------------------------------------------------------------
def upsample_deconv(x, weight, bias):
    """ConvTranspose2d(C, C, 3, stride=2, padding=1, output_padding=1).

    x: (N, C, H, W) NCHW.  weight: PyTorch layout (Cin, Cout, 3, 3); bias (Cout,).
    """
    N, C, H, W = x.shape
    Cin, Cout = weight.shape[0], weight.shape[1]
    isz = jnp.dtype(x.dtype).itemsize

    H8 = _round_up(H, 8)
    bytes_per_row = 2 * isz * (C * (W + 1) + Cout * 4 * W)
    TH = _pick_row_tile(H8, bytes_per_row)
    n_t = H8 // TH
    Wp = W + 1
    Hp = H8 + 8                                   # room for the 8-row halo slab

    # single cheap pad (zero row(s) below, one zero column right)
    xp = jnp.pad(x, ((0, 0), (0, 0), (0, Hp - H), (0, 1)))

    # Per-tap weight blocks.  Wt[:, :, kh, kw] = weight[:, :, 2-kh, 2-kw].
    # Phase p = 2*r + s (r = output-row parity, s = output-col parity):
    #   p=0: x[a,b]@w[1,1]
    #   p=1: x[a,b]@w[1,2] + x[a,b+1]@w[1,0]
    #   p=2: x[a,b]@w[2,1] + x[a+1,b]@w[0,1]
    #   p=3: x[a,b]@w[2,2] + x[a,b+1]@w[2,0] + x[a+1,b]@w[0,2] + x[a+1,b+1]@w[0,0]
    Wt = weight[:, :, ::-1, ::-1]
    z = jnp.zeros((Cin, Cout), weight.dtype)
    w4 = jnp.stack([
        jnp.concatenate([Wt[:, :, 1, 1], Wt[:, :, 1, 0],
                         Wt[:, :, 0, 1], Wt[:, :, 0, 0]], axis=1),  # tap (0,0)
        jnp.concatenate([z, Wt[:, :, 1, 2], z, Wt[:, :, 0, 2]], axis=1),  # (0,1)
        jnp.concatenate([z, z, Wt[:, :, 2, 1], Wt[:, :, 2, 0]], axis=1),  # (1,0)
        jnp.concatenate([z, z, z, Wt[:, :, 2, 2]], axis=1),               # (1,1)
    ], axis=0)                                    # (4, Cin, 4*Cout)
    b4 = jnp.tile(bias, 4)[None, :]               # (1, 4*Cout)

    flops = 2 * N * H * W * 9 * Cin * Cout
    bytes_accessed = int(isz * (N * C * Hp * Wp + N * Cout * H8 * 4 * W
                                + 4 * Cin * 4 * Cout + 4 * Cout))

    out = pl.pallas_call(
        _deconv_kernel,
        out_shape=jax.ShapeDtypeStruct((N, Cout, H8, 4 * W), x.dtype),
        grid=(N, n_t),
        in_specs=[
            pl.BlockSpec((1, C, TH, Wp), lambda n, t: (n, 0, t, 0)),
            pl.BlockSpec((1, C, 8, Wp),
                         lambda n, t: (n, 0, (t + 1) * (TH // 8), 0)),
            pl.BlockSpec((4, Cin, 4 * Cout), lambda n, t: (0, 0, 0)),
            pl.BlockSpec((1, 4 * Cout), lambda n, t: (0, 0)),
        ],
        out_specs=pl.BlockSpec((1, Cout, TH, 4 * W), lambda n, t: (n, 0, t, 0)),
        compiler_params=pltpu.CompilerParams(
            dimension_semantics=("parallel", "parallel"),
            vmem_limit_bytes=64 * 1024 * 1024),
        cost_estimate=pl.CostEstimate(flops=flops, transcendentals=0,
                                      bytes_accessed=bytes_accessed),
    )(xp, xp, w4, b4)

    y = out.reshape(N, Cout, 2 * H8, 2 * W)       # free reshape (row-major)
    if H8 != H:
        y = y[:, :, :2 * H, :]
    return y


def upsample_nearest2x(x):
    """MyUpsample2: nearest-neighbor 2x upsample (NCHW)."""
    N, C, H, W = x.shape
    isz = jnp.dtype(x.dtype).itemsize
    H8 = _round_up(H, 8)
    bytes_per_row = 2 * isz * (C * W + C * 4 * W)
    TH = _pick_row_tile(H8, bytes_per_row)
    n_t = H8 // TH
    xs = x if H8 == H else jnp.pad(x, ((0, 0), (0, 0), (0, H8 - H), (0, 0)))
    bytes_accessed = int(isz * (N * C * H8 * W + N * C * H8 * 4 * W))

    out = pl.pallas_call(
        _nearest_kernel,
        out_shape=jax.ShapeDtypeStruct((N, C, H8, 4 * W), x.dtype),
        grid=(N, n_t),
        in_specs=[pl.BlockSpec((1, C, TH, W), lambda n, t: (n, 0, t, 0))],
        out_specs=pl.BlockSpec((1, C, TH, 4 * W), lambda n, t: (n, 0, t, 0)),
        compiler_params=pltpu.CompilerParams(
            dimension_semantics=("parallel", "parallel"),
            vmem_limit_bytes=64 * 1024 * 1024),
        cost_estimate=pl.CostEstimate(flops=0, transcendentals=0,
                                      bytes_accessed=bytes_accessed),
    )(xs)

    y = out.reshape(N, C, 2 * H8, 2 * W)          # free reshape (row-major)
    if H8 != H:
        y = y[:, :, :2 * H, :]
    return y


def upsample_forward(x_nchw, if_deconv, weight=None, bias=None):
    if if_deconv:
        return upsample_deconv(x_nchw, weight, bias)
    return upsample_nearest2x(x_nchw)


# ---------------------------------------------------------------------------
# Pure-JAX references (correctness check only)
# ---------------------------------------------------------------------------
def _ref_deconv(x_nchw, weight, bias):
    # ConvTranspose2d == dilated conv with flipped kernel (OIHW).
    w_oihw = jnp.transpose(weight[:, :, ::-1, ::-1], (1, 0, 2, 3))
    y = lax.conv_general_dilated(
        x_nchw, w_oihw, window_strides=(1, 1),
        padding=((1, 2), (1, 2)), lhs_dilation=(2, 2),
        dimension_numbers=("NCHW", "OIHW", "NCHW"))
    return y + bias[None, :, None, None]


def _ref_nearest(x_nchw):
    N, C, H, W = x_nchw.shape
    return jnp.broadcast_to(
        x_nchw[:, :, :, None, :, None], (N, C, H, 2, W, 2)
    ).reshape(N, C, 2 * H, 2 * W)


# ---------------------------------------------------------------------------
if __name__ == "__main__":
    N, C, H, W = 2, 4, 16, 16
    key = jax.random.PRNGKey(0)
    kx, kw, kb = jax.random.split(key, 3)

    x = jax.random.normal(kx, (N, C, H, W), dtype=jnp.float32)
    # Deterministic synthetic ConvTranspose2d params (PyTorch layout Cin,Cout,kH,kW)
    bound = 1.0 / jnp.sqrt(jnp.float32(C * 3 * 3))
    weight = jax.random.uniform(kw, (C, C, 3, 3), jnp.float32, -bound, bound)
    bias = jax.random.uniform(kb, (C,), jnp.float32, -bound, bound)

    # if_deconv = True path
    y_deconv = jax.block_until_ready(upsample_forward(x, True, weight, bias))
    y_deconv_ref = _ref_deconv(x, weight, bias)
    assert y_deconv.shape == (N, C, 2 * H, 2 * W)
    assert jnp.allclose(y_deconv, y_deconv_ref, rtol=2e-4, atol=2e-4)

    # if_deconv = False path (MyUpsample2)
    y_near = jax.block_until_ready(upsample_forward(x, False))
    y_near_ref = _ref_nearest(x)
    assert y_near.shape == (N, C, 2 * H, 2 * W)
    assert jnp.allclose(y_near, y_near_ref)

    print("KERNEL_OK")
</pallas_src>

<mosaic_0001>
module attributes {stable_mosaic.version = 11 : i64} {
  func.func @_deconv_kernel(%arg0: i32, %arg1: i32, %arg2: memref<1x4x16x17xf32, #tpu.memory_space<vmem>>, %arg3: memref<1x4x8x17xf32, #tpu.memory_space<vmem>>, %arg4: memref<4x4x16xf32, #tpu.memory_space<vmem>>, %arg5: memref<1x16xf32, #tpu.memory_space<vmem>>, %arg6: memref<1x4x16x64xf32, #tpu.memory_space<vmem>>) attributes {dimension_semantics = [#tpu.dimension_semantics<parallel>, #tpu.dimension_semantics<parallel>], iteration_bounds = array<i64: 2, 1>, scalar_prefetch = 0 : i64, scratch_operands = 0 : i64, tpu.core_type = #tpu.core_type<tc>, window_params = [{transform_indices = @transform_0, window_bounds = array<i64: 1, 4, 16, 17>}, {transform_indices = @transform_1, window_bounds = array<i64: 1, 4, 8, 17>}, {pipeline_mode = #tpu.pipeline_mode<synchronous>, transform_indices = @transform_2, window_bounds = array<i64: 4, 4, 16>}, {pipeline_mode = #tpu.pipeline_mode<synchronous>, transform_indices = @transform_3, window_bounds = array<i64: 1, 16>}, {transform_indices = @transform_4, window_bounds = array<i64: 1, 4, 16, 64>}]} {
    %c0 = arith.constant 0 : index
    %c0_0 = arith.constant 0 : index
    %0 = vector.load %arg5[%c0, %c0_0] : memref<1x16xf32, #tpu.memory_space<vmem>>, vector<1x16xf32>
    %c0_1 = arith.constant 0 : index
    %c0_2 = arith.constant 0 : index
    %c0_3 = arith.constant 0 : index
    %1 = vector.load %arg4[%c0_1, %c0_2, %c0_3] : memref<4x4x16xf32, #tpu.memory_space<vmem>>, vector<1x4x16xf32>
    %2 = vector.shape_cast %1 : vector<1x4x16xf32> to vector<4x16xf32>
    %c1 = arith.constant 1 : index
    %c0_4 = arith.constant 0 : index
    %c0_5 = arith.constant 0 : index
    %3 = vector.load %arg4[%c1, %c0_4, %c0_5] : memref<4x4x16xf32, #tpu.memory_space<vmem>>, vector<1x4x16xf32>
    %4 = vector.shape_cast %3 : vector<1x4x16xf32> to vector<4x16xf32>
    %c2 = arith.constant 2 : index
    %c0_6 = arith.constant 0 : index
    %c0_7 = arith.constant 0 : index
    %5 = vector.load %arg4[%c2, %c0_6, %c0_7] : memref<4x4x16xf32, #tpu.memory_space<vmem>>, vector<1x4x16xf32>
    %6 = vector.shape_cast %5 : vector<1x4x16xf32> to vector<4x16xf32>
    %c3 = arith.constant 3 : index
    %c0_8 = arith.constant 0 : index
    %c0_9 = arith.constant 0 : index
    %7 = vector.load %arg4[%c3, %c0_8, %c0_9] : memref<4x4x16xf32, #tpu.memory_space<vmem>>, vector<1x4x16xf32>
    %8 = vector.shape_cast %7 : vector<1x4x16xf32> to vector<4x16xf32>
    %c0_i32 = arith.constant 0 : i32
    %c15_i32 = arith.constant 15 : i32
    %9 = arith.addi %c0_i32, %c15_i32 : i32
    %c1_i32 = arith.constant 1 : i32
    scf.for %arg7 = %c0_i32 to %9 step %c1_i32  : i32 {
      %c0_28 = arith.constant 0 : index
      %c0_29 = arith.constant 0 : index
      %49 = arith.index_cast %arg7 : i32 to index
      %c0_30 = arith.constant 0 : index
      %50 = vector.load %arg2[%c0_28, %c0_29, %49, %c0_30] : memref<1x4x16x17xf32, #tpu.memory_space<vmem>>, vector<1x4x1x17xf32>
      %51 = vector.shape_cast %50 : vector<1x4x1x17xf32> to vector<4x17xf32>
      %c1_i32_31 = arith.constant 1 : i32
      %52 = arith.addi %arg7, %c1_i32_31 : i32
      %c0_32 = arith.constant 0 : index
      %c0_33 = arith.constant 0 : index
      %53 = arith.index_cast %52 : i32 to index
      %c0_34 = arith.constant 0 : index
      %54 = vector.load %arg2[%c0_32, %c0_33, %53, %c0_34] : memref<1x4x16x17xf32, #tpu.memory_space<vmem>>, vector<1x4x1x17xf32>
      %55 = vector.shape_cast %54 : vector<1x4x1x17xf32> to vector<4x17xf32>
      %56 = tpu.transpose %51, [1, 0] : vector<4x17xf32> -> vector<17x4xf32>
      %57 = tpu.transpose %55, [1, 0] : vector<4x17xf32> -> vector<17x4xf32>
      %58 = vector.extract_strided_slice %56 {offsets = [0, 0], sizes = [16, 4], strides = [1, 1]} : vector<17x4xf32> to vector<16x4xf32>
      %59 = vector.extract_strided_slice %56 {offsets = [1, 0], sizes = [16, 4], strides = [1, 1]} : vector<17x4xf32> to vector<16x4xf32>
      %60 = vector.extract_strided_slice %57 {offsets = [0, 0], sizes = [16, 4], strides = [1, 1]} : vector<17x4xf32> to vector<16x4xf32>
      %61 = vector.extract_strided_slice %57 {offsets = [1, 0], sizes = [16, 4], strides = [1, 1]} : vector<17x4xf32> to vector<16x4xf32>
      %cst_35 = arith.constant dense<0.000000e+00> : vector<16x16xf32>
      %62 = tpu.matmul %58, %2, %cst_35 {dimension_numbers = #tpu.dot_dimension_numbers<[1], [0], [0], [1], [0, 0, 1, 1], [], []>} : vector<16x4xf32>, vector<4x16xf32>, vector<16x16xf32> -> vector<16x16xf32>
      %cst_36 = arith.constant dense<0.000000e+00> : vector<16x16xf32>
      %63 = tpu.matmul %59, %4, %cst_36 {dimension_numbers = #tpu.dot_dimension_numbers<[1], [0], [0], [1], [0, 0, 1, 1], [], []>} : vector<16x4xf32>, vector<4x16xf32>, vector<16x16xf32> -> vector<16x16xf32>
      %64 = arith.addf %62, %63 : vector<16x16xf32>
      %cst_37 = arith.constant dense<0.000000e+00> : vector<16x16xf32>
      %65 = tpu.matmul %60, %6, %cst_37 {dimension_numbers = #tpu.dot_dimension_numbers<[1], [0], [0], [1], [0, 0, 1, 1], [], []>} : vector<16x4xf32>, vector<4x16xf32>, vector<16x16xf32> -> vector<16x16xf32>
      %66 = arith.addf %64, %65 : vector<16x16xf32>
      %cst_38 = arith.constant dense<0.000000e+00> : vector<16x16xf32>
      %67 = tpu.matmul %61, %8, %cst_38 {dimension_numbers = #tpu.dot_dimension_numbers<[1], [0], [0], [1], [0, 0, 1, 1], [], []>} : vector<16x4xf32>, vector<4x16xf32>, vector<16x16xf32> -> vector<16x16xf32>
      %68 = arith.addf %66, %67 : vector<16x16xf32>
      %69 = vector.broadcast %0 : vector<1x16xf32> to vector<16x16xf32>
      %70 = arith.addf %68, %69 : vector<16x16xf32>
      %71 = vector.extract_strided_slice %70 {offsets = [0, 0], sizes = [16, 4], strides = [1, 1]} : vector<16x16xf32> to vector<16x4xf32>
      %72 = vector.extract_strided_slice %70 {offsets = [0, 4], sizes = [16, 4], strides = [1, 1]} : vector<16x16xf32> to vector<16x4xf32>
      %73 = vector.shape_cast %71 : vector<16x4xf32> to vector<16x1x4xf32>
      %74 = vector.shape_cast %72 : vector<16x4xf32> to vector<16x1x4xf32>
      %75 = tpu.concatenate %73, %74 in 1 : vector<16x1x4xf32>, vector<16x1x4xf32> -> vector<16x2x4xf32>
      %76 = vector.shape_cast %75 : vector<16x2x4xf32> to vector<32x4xf32>
      %77 = tpu.transpose %76, [1, 0] : vector<32x4xf32> -> vector<4x32xf32>
      %c0_39 = arith.constant 0 : index
      %c0_40 = arith.constant 0 : index
      %78 = arith.index_cast %arg7 : i32 to index
      %c0_41 = arith.constant 0 : index
      %79 = vector.load %arg6[%c0_39, %c0_40, %78, %c0_41] : memref<1x4x16x64xf32, #tpu.memory_space<vmem>>, vector<1x4x1x32xf32>
      %80 = vector.shape_cast %79 : vector<1x4x1x32xf32> to vector<4x32xf32>
      %81 = vector.shape_cast %77 : vector<4x32xf32> to vector<1x4x1x32xf32>
      tpu.vector_store %arg6[%c0_39, %c0_40, %78, %c0_41], %81 {strides = array<i32>} : memref<1x4x16x64xf32, #tpu.memory_space<vmem>>, vector<1x4x1x32xf32>,
      %82 = vector.extract_strided_slice %70 {offsets = [0, 8], sizes = [16, 4], strides = [1, 1]} : vector<16x16xf32> to vector<16x4xf32>
      %83 = vector.extract_strided_slice %70 {offsets = [0, 12], sizes = [16, 4], strides = [1, 1]} : vector<16x16xf32> to vector<16x4xf32>
      %84 = vector.shape_cast %82 : vector<16x4xf32> to vector<16x1x4xf32>
      %85 = vector.shape_cast %83 : vector<16x4xf32> to vector<16x1x4xf32>
      %86 = tpu.concatenate %84, %85 in 1 : vector<16x1x4xf32>, vector<16x1x4xf32> -> vector<16x2x4xf32>
      %87 = vector.shape_cast %86 : vector<16x2x4xf32> to vector<32x4xf32>
      %88 = tpu.transpose %87, [1, 0] : vector<32x4xf32> -> vector<4x32xf32>
      %c0_42 = arith.constant 0 : index
      %c0_43 = arith.constant 0 : index
      %89 = arith.index_cast %arg7 : i32 to index
      %c32_44 = arith.constant 32 : index
      %90 = vector.load %arg6[%c0_42, %c0_43, %89, %c32_44] : memref<1x4x16x64xf32, #tpu.memory_space<vmem>>, vector<1x4x1x32xf32>
      %91 = vector.shape_cast %90 : vector<1x4x1x32xf32> to vector<4x32xf32>
      %92 = vector.shape_cast %88 : vector<4x32xf32> to vector<1x4x1x32xf32>
      tpu.vector_store %arg6[%c0_42, %c0_43, %89, %c32_44], %92 {strides = array<i32>} : memref<1x4x16x64xf32, #tpu.memory_space<vmem>>, vector<1x4x1x32xf32>,
    }
    %c15_i32_10 = arith.constant 15 : i32
    %c0_11 = arith.constant 0 : index
    %c0_12 = arith.constant 0 : index
    %c15 = arith.constant 15 : index
    %c0_13 = arith.constant 0 : index
    %10 = vector.load %arg2[%c0_11, %c0_12, %c15, %c0_13] : memref<1x4x16x17xf32, #tpu.memory_space<vmem>>, vector<1x4x1x17xf32>
    %11 = vector.shape_cast %10 : vector<1x4x1x17xf32> to vector<4x17xf32>
    %c0_14 = arith.constant 0 : index
    %c0_15 = arith.constant 0 : index
    %c0_16 = arith.constant 0 : index
    %c0_17 = arith.constant 0 : index
    %12 = vector.load %arg3[%c0_14, %c0_15, %c0_16, %c0_17] : memref<1x4x8x17xf32, #tpu.memory_space<vmem>>, vector<1x4x1x17xf32>
    %13 = vector.shape_cast %12 : vector<1x4x1x17xf32> to vector<4x17xf32>
    %14 = tpu.transpose %11, [1, 0] : vector<4x17xf32> -> vector<17x4xf32>
    %15 = tpu.transpose %13, [1, 0] : vector<4x17xf32> -> vector<17x4xf32>
    %16 = vector.extract_strided_slice %14 {offsets = [0, 0], sizes = [16, 4], strides = [1, 1]} : vector<17x4xf32> to vector<16x4xf32>
    %17 = vector.extract_strided_slice %14 {offsets = [1, 0], sizes = [16, 4], strides = [1, 1]} : vector<17x4xf32> to vector<16x4xf32>
    %18 = vector.extract_strided_slice %15 {offsets = [0, 0], sizes = [16, 4], strides = [1, 1]} : vector<17x4xf32> to vector<16x4xf32>
    %19 = vector.extract_strided_slice %15 {offsets = [1, 0], sizes = [16, 4], strides = [1, 1]} : vector<17x4xf32> to vector<16x4xf32>
    %cst = arith.constant dense<0.000000e+00> : vector<16x16xf32>
    %20 = tpu.matmul %16, %2, %cst {dimension_numbers = #tpu.dot_dimension_numbers<[1], [0], [0], [1], [0, 0, 1, 1], [], []>} : vector<16x4xf32>, vector<4x16xf32>, vector<16x16xf32> -> vector<16x16xf32>
    %cst_18 = arith.constant dense<0.000000e+00> : vector<16x16xf32>
    %21 = tpu.matmul %17, %4, %cst_18 {dimension_numbers = #tpu.dot_dimension_numbers<[1], [0], [0], [1], [0, 0, 1, 1], [], []>} : vector<16x4xf32>, vector<4x16xf32>, vector<16x16xf32> -> vector<16x16xf32>
    %22 = arith.addf %20, %21 : vector<16x16xf32>
    %cst_19 = arith.constant dense<0.000000e+00> : vector<16x16xf32>
    %23 = tpu.matmul %18, %6, %cst_19 {dimension_numbers = #tpu.dot_dimension_numbers<[1], [0], [0], [1], [0, 0, 1, 1], [], []>} : vector<16x4xf32>, vector<4x16xf32>, vector<16x16xf32> -> vector<16x16xf32>
    %24 = arith.addf %22, %23 : vector<16x16xf32>
    %cst_20 = arith.constant dense<0.000000e+00> : vector<16x16xf32>
    %25 = tpu.matmul %19, %8, %cst_20 {dimension_numbers = #tpu.dot_dimension_numbers<[1], [0], [0], [1], [0, 0, 1, 1], [], []>} : vector<16x4xf32>, vector<4x16xf32>, vector<16x16xf32> -> vector<16x16xf32>
    %26 = arith.addf %24, %25 : vector<16x16xf32>
    %27 = vector.broadcast %0 : vector<1x16xf32> to vector<16x16xf32>
    %28 = arith.addf %26, %27 : vector<16x16xf32>
    %29 = vector.extract_strided_slice %28 {offsets = [0, 0], sizes = [16, 4], strides = [1, 1]} : vector<16x16xf32> to vector<16x4xf32>
    %30 = vector.extract_strided_slice %28 {offsets = [0, 4], sizes = [16, 4], strides = [1, 1]} : vector<16x16xf32> to vector<16x4xf32>
    %31 = vector.shape_cast %29 : vector<16x4xf32> to vector<16x1x4xf32>
    %32 = vector.shape_cast %30 : vector<16x4xf32> to vector<16x1x4xf32>
    %33 = tpu.concatenate %31, %32 in 1 : vector<16x1x4xf32>, vector<16x1x4xf32> -> vector<16x2x4xf32>
    %34 = vector.shape_cast %33 : vector<16x2x4xf32> to vector<32x4xf32>
    %35 = tpu.transpose %34, [1, 0] : vector<32x4xf32> -> vector<4x32xf32>
    %c0_21 = arith.constant 0 : index
    %c0_22 = arith.constant 0 : index
    %c15_23 = arith.constant 15 : index
    %c0_24 = arith.constant 0 : index
    %36 = vector.load %arg6[%c0_21, %c0_22, %c15_23, %c0_24] : memref<1x4x16x64xf32, #tpu.memory_space<vmem>>, vector<1x4x1x32xf32>
    %37 = vector.shape_cast %36 : vector<1x4x1x32xf32> to vector<4x32xf32>
    %38 = vector.shape_cast %35 : vector<4x32xf32> to vector<1x4x1x32xf32>
    tpu.vector_store %arg6[%c0_21, %c0_22, %c15_23, %c0_24], %38 {strides = array<i32>} : memref<1x4x16x64xf32, #tpu.memory_space<vmem>>, vector<1x4x1x32xf32>,
    %39 = vector.extract_strided_slice %28 {offsets = [0, 8], sizes = [16, 4], strides = [1, 1]} : vector<16x16xf32> to vector<16x4xf32>
    %40 = vector.extract_strided_slice %28 {offsets = [0, 12], sizes = [16, 4], strides = [1, 1]} : vector<16x16xf32> to vector<16x4xf32>
    %41 = vector.shape_cast %39 : vector<16x4xf32> to vector<16x1x4xf32>
    %42 = vector.shape_cast %40 : vector<16x4xf32> to vector<16x1x4xf32>
    %43 = tpu.concatenate %41, %42 in 1 : vector<16x1x4xf32>, vector<16x1x4xf32> -> vector<16x2x4xf32>
    %44 = vector.shape_cast %43 : vector<16x2x4xf32> to vector<32x4xf32>
    %45 = tpu.transpose %44, [1, 0] : vector<32x4xf32> -> vector<4x32xf32>
    %c0_25 = arith.constant 0 : index
    %c0_26 = arith.constant 0 : index
    %c15_27 = arith.constant 15 : index
    %c32 = arith.constant 32 : index
    %46 = vector.load %arg6[%c0_25, %c0_26, %c15_27, %c32] : memref<1x4x16x64xf32, #tpu.memory_space<vmem>>, vector<1x4x1x32xf32>
    %47 = vector.shape_cast %46 : vector<1x4x1x32xf32> to vector<4x32xf32>
    %48 = vector.shape_cast %45 : vector<4x32xf32> to vector<1x4x1x32xf32>
    tpu.vector_store %arg6[%c0_25, %c0_26, %c15_27, %c32], %48 {strides = array<i32>} : memref<1x4x16x64xf32, #tpu.memory_space<vmem>>, vector<1x4x1x32xf32>,
    return
  }
  func.func @transform_0(%arg0: i32, %arg1: i32) -> (i32, i32, i32, i32) {
    %c0_i32 = arith.constant 0 : i32
    %c0_i32_0 = arith.constant 0 : i32
    %c0_i32_1 = arith.constant 0 : i32
    return %arg0, %c0_i32, %arg1, %c0_i32_0 : i32, i32, i32, i32
  }
  func.func @transform_1(%arg0: i32, %arg1: i32) -> (i32, i32, i32, i32) {
    %c1_i32 = arith.constant 1 : i32
    %0 = arith.addi %arg1, %c1_i32 : i32
    %c2_i32 = arith.constant 2 : i32
    %1 = arith.muli %0, %c2_i32 : i32
    %c0_i32 = arith.constant 0 : i32
    %c0_i32_0 = arith.constant 0 : i32
    %c0_i32_1 = arith.constant 0 : i32
    return %arg0, %c0_i32, %1, %c0_i32_0 : i32, i32, i32, i32
  }
  func.func @transform_2(%arg0: i32, %arg1: i32) -> (i32, i32, i32) {
    %c0_i32 = arith.constant 0 : i32
    %c0_i32_0 = arith.constant 0 : i32
    %c0_i32_1 = arith.constant 0 : i32
    %c0_i32_2 = arith.constant 0 : i32
    return %c0_i32, %c0_i32_0, %c0_i32_1 : i32, i32, i32
  }
  func.func @transform_3(%arg0: i32, %arg1: i32) -> (i32, i32) {
    %c0_i32 = arith.constant 0 : i32
    %c0_i32_0 = arith.constant 0 : i32
    %c0_i32_1 = arith.constant 0 : i32
    return %c0_i32, %c0_i32_0 : i32, i32
  }
  func.func @transform_4(%arg0: i32, %arg1: i32) -> (i32, i32, i32, i32) {
    %c0_i32 = arith.constant 0 : i32
    %c0_i32_0 = arith.constant 0 : i32
    %c0_i32_1 = arith.constant 0 : i32
    return %arg0, %c0_i32, %arg1, %c0_i32_0 : i32, i32, i32, i32
  }
}

</mosaic_0001>

<bundles_post_ra>
// kernel: tpu_custom_call.1
= control target key start
LH: loop header
LB: loop body
LE: loop exit
PB: predicated region body
PF: predicated region fallthrough
CT: control target
= control target key end

     0   :  { %9 = vsyncpa [#allocation5], 0  ;;  %s3479_s0 = inlined_call_operand.vmem [shape: f32[2,4,24,17], index: 0, kind: input, shape index: {}]   ;;  %s3480_s1 = inlined_call_operand.vmem [shape: f32[2,4,24,17], index: 1, kind: input, shape index: {}]   ;;  %s3481_s2 = inlined_call_operand.vmem [shape: f32[4,4,16], index: 2, kind: input, shape index: {}]   ;;  %s3482_s3 = inlined_call_operand.vmem [shape: f32[1,16], index: 3, kind: input, shape index: {}]   ;;  %s3483_s4 = inlined_call_operand.hbm [shape: f32[2,4,16,64], index: 4, kind: output, shape index: {}]  }
   0x1   :  { %11 = vsyncpa [#allocation5 + $0x1], 0  ;;  %s2934_s15 = smov 0   ;;  %s2936_s16 = smov 0  }
   0x2   :  { %s2938_s17 = smov 0   ;;  %s2940_s18 = smov 0  }
   0x3   :  { %s2942_s19 = smov 0   ;;  %s2944_s20 = smov 0  }
   0x4 LB: > { %s2558_s21 = sadd.s32 4294967295, %s2888_s20   ;;  %s2559_s22 = sadd.s32 4294967294, %s2888_s20   ;;  %s2888_s20 = sphi %s2944_s20, %s17_s20   ;;  %s2884_s19 = sphi %s2942_s19, %s3491_s19   ;;  %s2880_s18 = sphi %s2940_s18, %s3490_s18   ;;  %s2876_s17 = sphi %s2938_s17, %s3489_s17   ;;  %s2872_s16 = sphi %s2936_s16, %s3488_s16   ;;  %s2868_s15 = sphi %s2934_s15, %s3487_s15  }
   0x5   : > { %s29_s23 = sadd.s32 1, %s2884_s19  ;;  %s38_s24 = sadd.s32 1, %s2876_s17 }
   0x6   : > { %p31_p0 = scmp.ge.s32.totalorder %s29_s23, 2  ;;  %p45_p1 = scmp.ne.s32.totalorder %s2876_s17, %s2872_s16 }
   0x7   : > { %p46_p2 = scmp.eq.s32.totalorder %s2888_s20, 0  ;;  %p151_p3 = scmp.eq.s32.totalorder %s2558_s21, 1 }
   0x8   : > { %s3493_s23 = smov (%p31_p0, %s29_s23), 0  ;;  %p156_p6 = scmp.ne.s32.totalorder %s2872_s16, %s2868_s15 }
   0x9   : > { %p2973_p4 = por %p46_p2, %p45_p1  ;;  %p2977_p5 = por %p151_p3, %p45_p1 }
   0xa   : > { %s33_s27 = ssub.s32 %s2884_s19, %s3493_s23  ;;  %p157_p8 = scmp.eq.s32.totalorder %s2559_s22, 1 }
   0xb   : > { %p36_p7 = scmp.eq.s32.totalorder %s33_s27, 0  ;;  %p2561_p10 = scmp.ge.s32.totalorder %s2888_s20, 2 }
   0xc   : > { %p2988_p9 = por %p157_p8, %p156_p6 }
   0xd   : > { %s2986_s28 = scalar_select %p36_p7, %s2876_s17, %s38_s24  }
   0xe   : > { %179 = sbr.rel (%p2561_p10) target bundleno = 39 (0x27), region = 24 }
  0x13   : > { %182 = sbr.rel (!%p2973_p4) target bundleno = 32 (0x20), region = 28  ;;  %s184_s30 = sand.u32 (%p2973_p4), 1, %s2876_s17  }
  0x14   : > { %s2684_s5 = smul.u32 (%p2973_p4), 96, %s2884_s19  ;;  %s2562_s6 = sshll.u32 (%p2973_p4), %s184_s30, 6 }
  0x15   : > { %s186_s10 = scalar_lea.vmem (%p2973_p4), [#allocation2], %s2562_s6   ;;  %s2890_s11 = smov (%p2973_p4), 0  }
  0x16   : > { %s196_s9 = scalar_lea.vmem (%p2973_p4), %s3479_s0, %s2684_s5  }
  0x18 LB: >> { %v282_v0 = vld [vmem:[%s196_s9] sm:$0xff]  ;;  %v284_v1 = vld [vmem:[%s196_s9 + $0x8] sm:$0xff]  ;;  %v286_v2 = vld [vmem:[%s196_s9 + $0x18] sm:$0xff]  ;;  %s276_s11 = sadd.s32 1, %s2892_s11   ;;  %s2892_s11 = sphi %s2890_s11, %s276_s11  }
  0x19   : >> { %283 = vst [vmem:[%s186_s10] sm:$0xff] %v282_v0  ;;  %285 = vst [vmem:[%s186_s10 + $0x8] sm:$0xff] %v284_v1  ;;  %v288_v3 = vld [vmem:[%s196_s9 + $0x20] sm:$0xff]  ;;  %v290_v4 = vld [vmem:[%s196_s9 + $0x30] sm:$0xff]  ;;  %p275_p11 = scmp.ge.s32.totalorder %s276_s11, 1 }
  0x1a   : >> { %287 = vst [vmem:[%s186_s10 + $0x10] sm:$0xff] %v286_v2  ;;  %v292_v5 = vld [vmem:[%s196_s9 + $0x38] sm:$0xff]  ;;  %289 = vst [vmem:[%s186_s10 + $0x18] sm:$0xff] %v288_v3  ;;  %v294_v6 = vld [vmem:[%s196_s9 + $0x48] sm:$0xff] }
  0x1b   : >> { %291 = vst [vmem:[%s186_s10 + $0x20] sm:$0xff] %v290_v4  ;;  %293 = vst [vmem:[%s186_s10 + $0x28] sm:$0xff] %v292_v5  ;;  %v296_v7 = vld [vmem:[%s196_s9 + $0x50] sm:$0xff]  ;;  %278 = sbr.rel (!%p275_p11) target bundleno = 24 (0x18), region = 195 }
  0x1c   : >> { %295 = vst [vmem:[%s186_s10 + $0x30] sm:$0xff] %v294_v6  ;;  %297 = vst [vmem:[%s186_s10 + $0x38] sm:$0xff] %v296_v7 }
  0x20 PF: > { %341 = sbr.rel (!%p2973_p4) target bundleno = 39 (0x27), region = 80  ;;  %s343_s12 = sand.u32 (%p2973_p4), 1, %s2876_s17  }
  0x21   : > { %s2573_s13 = smul.u32 (%p2973_p4), 96, %s2884_s19  ;;  %s2572_s14 = sshll.u32 (%p2973_p4), %s343_s12, 5 }
  0x22   : > { %s345_s27 = scalar_lea.vmem (%p2973_p4), [#allocation3], %s2572_s14 }
  0x23   : > { %s2458_s24 = scalar_lea.vmem (%p2973_p4), %s3480_s1, %s2573_s13 }
  0x24   : > { %v2574_v8 = vld [vmem:[%s2458_s24 + $0x10] sm:$0xff] (%p2973_p4)  ;;  %v2575_v9 = vld [vmem:[%s2458_s24 + $0x28] sm:$0xff] (%p2973_p4)  ;;  %v2576_v10 = vld [vmem:[%s2458_s24 + $0x40] sm:$0xff] (%p2973_p4) }
  0x25   : > { %387 = vst [vmem:[%s345_s27] sm:$0xff] %v2574_v8  ;;  %389 = vst [vmem:[%s345_s27 + $0x8] sm:$0xff] %v2575_v9  ;;  %v2577_v11 = vld [vmem:[%s2458_s24 + $0x58] sm:$0xff] }
  0x26   : > { %391 = vst [vmem:[%s345_s27 + $0x10] sm:$0xff] %v2576_v10  ;;  %393 = vst [vmem:[%s345_s27 + $0x18] sm:$0xff] %v2577_v11 }
  0x27 PF: > { %p2578_p12 = scmp.ge.s32.totalorder %s2888_s20, 1  ;;  %p398_p13 = scmp.lt.s32.totalorder %s2888_s20, 3 }
  0x29   : > { %p399_p0 = pnand %p2578_p12, %p398_p13 }
  0x2a   : > { %s3012_s25 = sand.u32 (!%p399_p0), 1, %s2872_s16   ;;  %s3047_s30 = smov (!%p399_p0), 0  }
  0x2b   : > { %402 = sbr.rel (%p399_p0) target bundleno = 1764 (0x6e4), region = 118  ;;  %s2579_s8 = sshll.u32 (!%p399_p0), %s3012_s25, 6 }
  0x2c   : > { %s2580_s9 = sshll.u32 (!%p399_p0), %s3012_s25, 5  ;;  %s3041_s22 = scalar_lea.vmem (!%p399_p0), [#allocation2], %s2579_s8 }
  0x2d   : > { %s3043_s24 = scalar_lea.vmem (!%p399_p0), [#allocation3], %s2580_s9  ;;  %s3045_s27 = scalar_lea.vmem (!%p399_p0), [#allocation4], %s2579_s8 }
  0x30   : > { %v3017_v12 = vld [vmem:[%s3482_s3] ss:$0 sm:$0xff]  ;;  %v3029_v14 = vld [vmem:[%s3481_s2 + $0x4] sm:$0xf]  ;;  %v3034_v15 = vld [vmem:[%s3481_s2 + $0x8] sm:$0xf] }
  0x31   : > { %v3022_v13 = vld [vmem:[%s3481_s2] sm:$0xf]  ;;  %v3039_v16 = vld [vmem:[%s3481_s2 + $0xc] sm:$0xf] }
  0x32 LB: >> { %s463_s5 = scalar_lea.vmem %s3041_s22, %s2896_s30 [#allocation2]  ;;  %vm479_vm0 = vcmask 1041409   ;;  %vm482_vm1 = vcmask 1042434   ;;  %vm485_vm2 = vcmask 1043459   ;;  %vm577_vm3 = vcmask 1043456   ;;  %s2899_s6 = smov 124   ;;  %s2896_s30 = sphi %s3047_s30, %s462_s30  }
  0x33   : >> { %v464_v17 = vld [vmem:[%s463_s5] sm:$0x1]  ;;  %v465_v18 = vld [vmem:[%s463_s5 + $0x10] sm:$0x1]  ;;  %v2586_v24 = vld [vmem:[%s463_s5 + $0x11] sm:$0x1]  ;;  %2649 = vmatprep.subr.msk.mxu1 %vm577_vm3, %v3022_v13  ;;  %2644 = vmatprep.subr.msk.mxu0 %vm577_vm3, %v3029_v14  ;;  %v915_v59 = vlaneseq  ;;  %s3216_s8 = scalar_lea.vmem %s3045_s27, %s2896_s30 [#allocation4] }
  0x34   : >> { %v466_v19 = vld [vmem:[%s463_s5 + $0x20] sm:$0x1]  ;;  %v467_v20 = vld [vmem:[%s463_s5 + $0x30] sm:$0x1]  ;;  %v478_v21 = vrot.slane %v465_v18, 7  ;;  %v524_v28 = vrot.slane %v2586_v24, 7  ;;  %2650 = vmatpush3.msk.msra.mxu1 %vm577_vm3, %v3022_v13  ;;  %2645 = vmatpush3.msk.msra.mxu0 %vm577_vm3, %v3029_v14 }
  0x35   : >> { %v481_v22 = vrot.slane %v466_v19, 6  ;;  %v484_v23 = vrot.slane %v467_v20, 5  ;;  %v2587_v25 = vld [vmem:[%s463_s5 + $0x21] sm:$0x1]  ;;  %v2588_v31 = vld [vmem:[%s463_s5 + $0x31] sm:$0x1]  ;;  %2654 = vmatprep.subr.msk.mxu0 %vm577_vm3, %v3034_v15  ;;  %2659 = vmatprep.subr.msk.mxu1 %vm577_vm3, %v3039_v16 }
  0x36   : >> { %v480_v26 = vsel %vm479_vm0, %v478_v21, %v464_v17  ;;  %v2585_v27 = vld [vmem:[%s463_s5 + $0x1] sm:$0x1]  ;;  %v526_v32 = vrot.slane %v2587_v25, 6  ;;  %v528_v34 = vrot.slane %v2588_v31, 5  ;;  %vm572_vm4 = vcmask 31744   ;;  %s2901_s7 = smov 120  }
  0x37   : >> { %v483_v29 = vsel %vm482_vm1, %v481_v22, %v480_v26  ;;  %v525_v33 = vsel %vm479_vm0, %v524_v28, %v2585_v27  ;;  %vm566_vm5 = vcmask 1046528   ;;  %v2898_v60 = vmov 1966171168   ;;  %s2902_s9 = smov 32   ;;  %s462_s30 = sadd.s32 1, %s2896_s30  }
  0x38   : >> { %v486_v30 = vsel %vm485_vm2, %v484_v23, %v483_v29  ;;  %v527_v35 = vsel %vm482_vm1, %v526_v32, %v525_v33  ;;  %v926_v61 = vunpack.c.l.s4 %v2898_v60  ;;  %v3088_v1 = vshrl.u32 %v915_v59, 7  ;;  %p459_p1 = scmp.ge.s32.totalorder %s462_s30, 15  }
  0x39   : >> { %488 = vxpose.xlu0.b32.start.end [1/1] (short) (narrow) %v486_v30, 24  ;;  %v529_v36 = vsel %vm485_vm2, %v528_v34, %v527_v35  ;;  %vm1150_vm6 = vcmask 1040384   ;;  %vm1317_vm7 = vcmask 253952   ;;  %vm1419_vm8 = vcmask 516352   ;;  %s2903_s10 = smov (%p459_p1), 124   ;;  %s2904_s11 = smov (%p459_p1), 120  }
  0x3a   : >> { %v927_v2 = vunpack.c.0.s8 %v926_v61  ;;  %v3097_v18 = vsub.s32 0, %v3088_v1  ;;  %s2905_s12 = smov (%p459_p1), 32   ;;  %s2618_s13 = sshll.u32 (%p459_p1), %s2880_s18, 10 }
  0x3b   : > { %s2397_s14 = sshll.u32 (%p459_p1), %s3045_s27, 4  ;;  %s2382_s18 = scalar_lea.sflag (%p459_p1), [#allocation5], %s3012_s25  ;;  %s3427_s14 = int_to_ptr.vmem [resolvable:$true] %s2397_s14 }
  0x3c   : >> { %v3092_v8 = vsub.s32 %v927_v2, %v3088_v1  ;;  %s2792_s30 = scalar_lea.vmem (%p459_p1), %s3427_s14, 1024  ;;  %s2906_s5 = smov (%p459_p1), [#allocation4]  }
  0x3d   : > { %p2793_p2 = scmp.ne.s32.totalorder (%p459_p1), %s3427_s14, %s2792_s30 }
  0x3f   : > { %p2794_p3 = pnand (%p459_p1), %p2793_p2, %p2977_p5 }
  0x41   : > { %p2795_p4 = pneg (%p459_p1), %p2794_p3 }
  0x42   : >> { %531 = vxpose.xlu0.b32.start.end [1/1] (short) (narrow) %v529_v36, 24 }
  0xb5   : >> { %v504_v37 = vpop.trf.xlu0 }
  0xb6   : >> { %2651 = vmatprep.mubr.msk.f32.mxu1 %vm572_vm4, %v504_v37  ;;  %v567_v39 = vrot.slane %v504_v37, 1 }
  0xb9   : >> { %v505_v38 = vpop.trf.xlu0 }
  0xba   : >> { %v568_v40 = vrot.slane %v505_v38, 1  ;;  %2652 = vmatmul.mubr.msk.f32.vlgmr.msra.gmra.mxu1 %vm572_vm4, %v505_v38 }
  0xbb   : >> { %2660 = vmatpush3.msk.msra.mxu1 %vm577_vm3, %v3039_v16 }
  0xbc   : >> { %v569_v41 = vsel %vm566_vm5, %v567_v39, %v568_v40  ;;  %2669 = vmatprep.subr.msk.mxu1 (%p459_p1), %vm577_vm3, %v3022_v13 }
  0xbd   : >> { %2646 = vmatprep.mubr.msk.f32.mxu0 %vm572_vm4, %v569_v41  ;;  %v506_v42 = vpop.trf.xlu0 }
  0xbe   : >> { %v570_v43 = vrot.slane %v506_v42, 1 }
  0xc0   : >> { %v571_v44 = vsel %vm566_vm5, %v568_v40, %v570_v43 }
  0xc1   : >> { %2647 = vmatmul.mubr.msk.f32.vlgmr.msra.gmra.mxu0 %vm572_vm4, %v571_v44  ;;  %v547_v45 = vpop.trf.xlu0 }
  0xc2   : >> { %2656 = vmatprep.mubr.msk.f32.mxu0 %vm572_vm4, %v547_v45  ;;  %2655 = vmatpush3.msk.msra.mxu0 %vm577_vm3, %v3034_v15  ;;  %v825_v47 = vrot.slane %v547_v45, 1 }
  0xc3   : > { %2664 = vmatprep.subr.msk.mxu0 (%p459_p1), %vm577_vm3, %v3029_v14 }
  0xc5   : >> { %v548_v46 = vpop.trf.xlu0 }
  0xc6   : >> { %v826_v48 = vrot.slane %v548_v46, 1  ;;  %2657 = vmatmul.mubr.msk.f32.vlgmr.msra.gmra.mxu0 %vm572_vm4, %v548_v46 }
  0xc7   : > { %2665 = vmatpush3.msk.msra.mxu0 (%p459_p1), %vm577_vm3, %v3029_v14 }
  0xc8   : >> { %v827_v49 = vsel %vm566_vm5, %v825_v47, %v826_v48  ;;  %2674 = vmatprep.subr.msk.mxu0 (%p459_p1), %vm577_vm3, %v3034_v15 }
  0xc9   : >> { %2661 = vmatprep.mubr.msk.f32.mxu1 %vm572_vm4, %v827_v49  ;;  %v549_v50 = vpop.trf.xlu0 }
  0xca   : >> { %v828_v51 = vrot.slane %v549_v50, 1 }
  0xcc   : >> { %v829_v52 = vsel %vm566_vm5, %v826_v48, %v828_v51 }
  0xcd   : >> { %2662 = vmatmul.mubr.msk.f32.vlgmr.msra.gmra.mxu1 %vm572_vm4, %v829_v52 }
  0xce   : > { %2670 = vmatpush3.msk.msra.mxu1 (%p459_p1), %vm577_vm3, %v3022_v13 }
  0xcf   : > { %2679 = vmatprep.subr.msk.mxu1 (%p459_p1), %vm577_vm3, %v3039_v16 }
 0x17a   : >> { %v2653_v55 = vpop.f32.mrf.mxu1 }
 0x17c   : >> { %v729_v57 = vpop.f32.mrf.mxu1 }
 0x181   : >> { %v2648_v53 = vpop.f32.mrf.mxu0 }
 0x182   : >> { %v735_v5 = vadd.f32 %v2653_v55, %v2648_v53 }
 0x183   : >> { %v647_v54 = vpop.f32.mrf.mxu0 }
 0x184   : >> { %v730_v62 = vadd.f32 %v729_v57, %v647_v54 }
 0x186   : >> { %v2658_v56 = vpop.f32.mrf.mxu0 }
 0x187   : >> { %v823_v7 = vadd.f32 %v2658_v56, %v735_v5 }
 0x188   : >> { %v813_v58 = vpop.f32.mrf.mxu0 }
 0x189   : >> { %v822_v0 = vadd.f32 %v813_v58, %v730_v62 }
 0x18d   : >> { %v2663_v63 = vpop.f32.mrf.mxu1 }
 0x18e   : >> { %v913_v10 = vadd.f32 %v2663_v63, %v823_v7 }
 0x18f   : >> { %v903_v3 = vpop.f32.mrf.mxu1 }
 0x190   : >> { %v912_v4 = vadd.f32 %v903_v3, %v822_v0  ;;  %v921_v22 = vadd.f32 %v3017_v12, %v913_v10 }
 0x192   : >> { %v920_v6 = vadd.f32 %v3017_v12, %v912_v4  ;;  %v980_v26 = vrot.slane %v921_v22, %v3092_v8  ;;  %v973_v32 = vcombine.high %v921_v22, %v921_v22  ;;  %v2900_v4 = vmov 1983009808  }
 0x193   : >> { %v1186_v5 = vunpack.c.l.s4 %v2900_v4 }
 0x194   : >> { %v924_v9 = vcombine.high %v920_v6, %v920_v6  ;;  %v931_v11 = vrot.slane %v920_v6, %v3092_v8  ;;  %v988_v29 = vcombine.high %v980_v26, %v980_v26  ;;  %v3124_v30 = vrot.slane %v980_v26, %v3092_v8 }
 0x195   : >> { %v987_v35 = vrot.slane %v973_v32, %v3092_v8  ;;  %v1187_v7 = vunpack.c.0.s8 %v1186_v5 }
 0x196   : >> { %v938_v17 = vrot.slane %v924_v9, %v3092_v8  ;;  %v939_v19 = vcombine.high %v931_v11, %v931_v11  ;;  %v3100_v20 = vrot.slane %v931_v11, %v3092_v8  ;;  %v1010_v33 = vrot.slane %v988_v29, %v3092_v8 }
 0x197   : >> { %v1073_v34 = vrot.slane %v3124_v30, %v3097_v18  ;;  %v1018_v37 = vcombine.high %v3124_v30, %v3124_v30  ;;  %v3139_v38 = vrot.slane %v987_v35, %v3092_v8  ;;  %v989_v40 = vcombine.high %v987_v35, %v987_v35 }
 0x198   : >> { %v3103_v21 = vrot.slane %v938_v17, %v3092_v8  ;;  %v3107_v23 = vrot.slane %v939_v19, %v3092_v8  ;;  %v1041_v24 = vrot.slane %v3100_v20, %v3097_v18  ;;  %v3120_v28 = vcombine.high %v3100_v20, %v3100_v20 }
 0x199   : >> { %v1077_v36 = vrot.slane %v1010_v33, %v3097_v18  ;;  %v1081_v39 = vrot.slane %v1018_v37, %v3097_v18  ;;  %v1089_v41 = vrot.slane %v3139_v38, %v3097_v18  ;;  %v1020_v42 = vcombine.high %v1010_v33, %v1010_v33 }
 0x19a   : >> { %v1057_v25 = vrot.slane %v3103_v21, %v3097_v18  ;;  %1102 = vrot.lane.b32.xlu1 %v1041_v24, %s2899_s6  ;;  %v1045_v27 = vrot.slane %v3107_v23, %v3097_v18  ;;  %v1049_v31 = vrot.slane %v3120_v28, %v3097_v18  ;;  %v3148_v44 = vrot.slane %v989_v40, %v3092_v8 }
 0x19b   : >> { %v1085_v43 = vrot.slane %v1020_v42, %v3097_v18  ;;  %v3155_v46 = vcombine.high %v3139_v38, %v3139_v38  ;;  %v940_v47 = vcombine.high %v938_v17, %v938_v17  ;;  %v971_v49 = vcombine.high %v3107_v23, %v3107_v23 }
 0x19c   : >> { %1110 = vrot.lane.b32.xlu0 %v1057_v25, %s2899_s6  ;;  %v1093_v45 = vrot.slane %v3148_v44, %v3097_v18  ;;  %v970_v53 = vcombine.high %v3103_v21, %v3103_v21  ;;  %v1021_v57 = vcombine.high %v3148_v44, %v3148_v44  ;;  %v3184_v19 = vsub.s32 %v1187_v7, %v3088_v1 }
 0x19d   : >> { %v1097_v48 = vrot.slane %v3155_v46, %v3097_v18  ;;  %v1053_v50 = vrot.slane %v971_v49, %v3097_v18  ;;  %v968_v51 = vrot.slane %v940_v47, %v3092_v8 }
 0x19e   : >> { %1104 = vrot.lane.b32.xlu1 %v1045_v27, %s2899_s6  ;;  %v1065_v54 = vrot.slane %v970_v53, %v3097_v18  ;;  %v1101_v58 = vrot.slane %v1021_v57, %v3097_v18 }
 0x19f   : >> { %v1061_v52 = vrot.slane %v968_v51, %v3097_v18  ;;  %v972_v55 = vcombine.high %v968_v51, %v968_v51 }
 0x1a1   : >> { %v1069_v56 = vrot.slane %v972_v55, %v3097_v18 }
 0x1a2   : >> { %1106 = vrot.lane.b32.xlu1 %v1049_v31, %s2899_s6 }
 0x1a6   : >> { %1118 = vrot.lane.b32.xlu1 %v1073_v34, %s2899_s6 }
 0x1aa   : >> { %1120 = vrot.lane.b32.xlu1 %v1077_v36, %s2899_s6 }
 0x1ae   : >> { %1122 = vrot.lane.b32.xlu1 %v1081_v39, %s2899_s6 }
 0x1b2   : >> { %1126 = vrot.lane.b32.xlu1 %v1089_v41, %s2899_s6 }
 0x1b6   : >> { %1124 = vrot.lane.b32.xlu1 %v1085_v43, %s2899_s6 }
 0x1ba   : >> { %1128 = vrot.lane.b32.xlu1 %v1093_v45, %s2899_s6 }
 0x1be   : >> { %1130 = vrot.lane.b32.xlu1 %v1097_v48, %s2899_s6 }
 0x1c2   : >> { %1108 = vrot.lane.b32.xlu1 %v1053_v50, %s2899_s6 }
 0x1c6   : >> { %1112 = vrot.lane.b32.xlu1 %v1061_v52, %s2899_s6 }
 0x1ca   : >> { %1114 = vrot.lane.b32.xlu1 %v1065_v54, %s2899_s6 }
 0x1ce   : >> { %1116 = vrot.lane.b32.xlu1 %v1069_v56, %s2899_s6 }
 0x1d2   : >> { %1132 = vrot.lane.b32.xlu1 %v1101_v58, %s2899_s6  ;;  %s2796_s6 = sshll.u32 (%p459_p1), %s2906_s5, 4  ;;  %s2797_s6 = int_to_ptr.vmem [resolvable:$false] %s2796_s6 }
 0x1d3   : > { %p2799_p6 = scmp.lt.s32.totalorder (%p459_p1), %s3427_s14, %s2797_s6 }
 0x20c   : >> { %v1103_v59 = vpop.permute.xlu1 %1102 }
 0x20d   : >> { %v1151_v11 = vsel %vm1150_vm6, %v3100_v20, %v1103_v59 }
 0x20e   : >> { %v1111_v39 = vpop.permute.xlu0 %1110 }
 0x210   : >> { %v1105_v60 = vpop.permute.xlu1 %1104 }
 0x211   : >> { %v1152_v10 = vsel %vm1150_vm6, %v3107_v23, %v1105_v60 }
 0x212   : >> { %v1183_v22 = vcombine.low %v1151_v11, %v1152_v10 }
 0x214   : >> { %v1107_v61 = vpop.permute.xlu1 %1106  ;;  %v1191_v32 = vrot.slane %v1183_v22, %v3184_v19 }
 0x215   : >> { %v1153_v25 = vsel %vm1150_vm6, %v3120_v28, %v1107_v61 }
 0x218   : >> { %v1119_v62 = vpop.permute.xlu1 %1118 }
 0x219   : >> { %v1159_v20 = vsel %vm1150_vm6, %v3124_v30, %v1119_v62  ;;  %v1155_v30 = vsel %vm1150_vm6, %v3103_v21, %v1111_v39 }
 0x21c   : >> { %v1121_v63 = vpop.permute.xlu1 %1120 }
 0x21d   : >> { %v1160_v26 = vsel %vm1150_vm6, %v1010_v33, %v1121_v63 }
 0x21e   : >> { %v1217_v1 = vcombine.low %v1159_v20, %v1160_v26 }
 0x220   : >> { %v1123_v0 = vpop.permute.xlu1 %1122  ;;  %v1225_v33 = vrot.slane %v1217_v1, %v3184_v19  ;;  %v1425_v1 = vld [vmem:[%s3041_s22 + $0x1f] sm:$0x1] (%p459_p1) }
 0x221   : >> { %v1161_v27 = vsel %vm1150_vm6, %v1018_v37, %v1123_v0 }
 0x224   : >> { %v1127_v2 = vpop.permute.xlu1 %1126 }
 0x225   : >> { %v1163_v50 = vsel %vm1150_vm6, %v3139_v38, %v1127_v2 }
 0x228   : >> { %v1125_v3 = vpop.permute.xlu1 %1124 }
 0x229   : >> { %v1162_v17 = vsel %vm1150_vm6, %v1020_v42, %v1125_v3 }
 0x22a   : >> { %v1218_v23 = vcombine.low %v1161_v27, %v1162_v17 }
 0x22c   : >> { %v1129_v6 = vpop.permute.xlu1 %1128  ;;  %v1232_v36 = vrot.slane %v1218_v23, %v3184_v19 }
 0x22d   : >> { %v1164_v45 = vsel %vm1150_vm6, %v3148_v44, %v1129_v6 }
 0x22e   : >> { %v1233_v41 = vcombine.low %v1225_v33, %v1232_v36  ;;  %v1234_v52 = vcombine.low %v1163_v50, %v1164_v45  ;;  %v1436_v36 = vrot.slane (%p459_p1), %v1425_v1, 7  ;;  %v1429_v33 = vld [vmem:[%s3043_s24 + $0x8] sm:$0x1] (%p459_p1) }
 0x230   : >> { %v1131_v9 = vpop.permute.xlu1 %1130 }
 0x231   : >> { %v1165_v56 = vsel %vm1150_vm6, %v3155_v46, %v1131_v9 }
 0x234   : >> { %v1109_v24 = vpop.permute.xlu1 %1108 }
 0x235   : >> { %v1154_v29 = vsel %vm1150_vm6, %v971_v49, %v1109_v24 }
 0x236   : >> { %v1184_v31 = vcombine.low %v1153_v25, %v1154_v29 }
 0x238   : >> { %v1198_v34 = vrot.slane %v1184_v31, %v3184_v19  ;;  %v1113_v35 = vpop.permute.xlu1 %1112 }
 0x239   : >> { %v1156_v40 = vsel %vm1150_vm6, %v968_v51, %v1113_v35  ;;  %v1427_v35 = vld [vmem:[%s3041_s22 + $0x3f] sm:$0x1] (%p459_p1) }
 0x23a   : >> { %v1199_v28 = vcombine.low %v1191_v32, %v1198_v34  ;;  %v1200_v42 = vcombine.low %v1155_v30, %v1156_v40  ;;  %v1424_v32 = vld [vmem:[%s3041_s22 + $0xf] sm:$0x1] (%p459_p1)  ;;  %v1442_v39 = vrot.slane (%p459_p1), %v1427_v35, 5  ;;  %v1482_v30 = vrot.slane (%p459_p1), %v1429_v33, 7 }
 0x23b   : > { %v1426_v34 = vld [vmem:[%s3041_s22 + $0x2f] sm:$0x1] (%p459_p1)  ;;  %v1438_v40 = vsel (%p459_p1), %vm479_vm0, %v1436_v36, %v1424_v32 }
 0x23c   : >> { %v1115_v37 = vpop.permute.xlu1 %1114  ;;  %1322 = vrot.lane.b32.xlu1 %v1199_v28, %s2901_s7  ;;  %v1208_v51 = vrot.slane %v1200_v42, %v3184_v19 }
 0x23d   : >> { %v1157_v47 = vsel %vm1150_vm6, %v970_v53, %v1115_v37  ;;  %v1242_v53 = vrot.slane %v1234_v52, %v3184_v19  ;;  %v1430_v37 = vld [vmem:[%s3043_s24 + $0x10] sm:$0x1] (%p459_p1) }
 0x23e   : > { %v1484_v45 = vrot.slane (%p459_p1), %v1430_v37, 6 }
 0x240   : >> { %1326 = vrot.lane.b32.xlu1 %v1233_v41, %s2901_s7  ;;  %v1117_v43 = vpop.permute.xlu1 %1116 }
 0x241   : >> { %v1158_v48 = vsel %vm1150_vm6, %v972_v55, %v1117_v43  ;;  %v1431_v43 = vld [vmem:[%s3043_s24 + $0x18] sm:$0x1] (%p459_p1) }
 0x242   : >> { %v1201_v49 = vcombine.low %v1157_v47, %v1158_v48  ;;  %v1486_v47 = vrot.slane (%p459_p1), %v1431_v43, 5 }
 0x244   : >> { %v1215_v54 = vrot.slane %v1201_v49, %v3184_v19  ;;  %v1133_v21 = vpop.permute.xlu1 %1132 }
 0x245   : >> { %v1166_v58 = vsel %vm1150_vm6, %v1021_v57, %v1133_v21 }
 0x246   : >> { %v1235_v44 = vcombine.low %v1165_v56, %v1166_v58  ;;  %v1216_v59 = vcombine.low %v1208_v51, %v1215_v54 }
 0x248   : >> { %v1249_v55 = vrot.slane %v1235_v44, %v3184_v19  ;;  %1324 = vrot.lane.b32.xlu0 %v1216_v59, %s2901_s7 }
 0x24a   : >> { %v1250_v60 = vcombine.low %v1242_v53, %v1249_v55 }
 0x24c   : >> { %1328 = vrot.lane.b32.xlu0 %v1250_v60, %s2901_s7  ;;  %s2798_s7 = scalar_lea.vmem (%p459_p1), %s2797_s6, 2048 }
 0x24d   : > { %p2800_p7 = scmp.lt.s32.totalorder (%p459_p1), %s2798_s7, %s2792_s30 }
 0x24f   : > { %p2801_p8 = por (%p459_p1), %p2800_p7, %p2799_p6 }
 0x251   : > { %p2802_p11 = pnand (%p459_p1), %p2801_p8, %p2795_p4 }
 0x26a   : >> { %1255 = vxpose.xlu0.b32.start [1/4] (short) (narrow) %v1199_v28, 8  ;;  %v1439_v28 = vrot.slane (%p459_p1), %v1426_v34, 6 }
 0x26c   : > { %v1441_v42 = vsel (%p459_p1), %vm482_vm1, %v1439_v28, %v1438_v40 }
 0x26d   : > { %v1444_v13 = vsel (%p459_p1), %vm485_vm2, %v1442_v39, %v1441_v42 }
 0x26e   : >> { %1256 = vxpose.xlu0.b32.cont [2/4] (short) (narrow) %v1216_v59, 8 }
 0x272   : >> { %1257 = vxpose.xlu0.b32.cont [3/4] (short) (narrow) %v1233_v41, 8  ;;  %v1428_v41 = vld [vmem:[%s3043_s24] sm:$0x1] (%p459_p1)  ;;  %s3425_s24 = scalar_lea.hbm (%p459_p1), %s3483_s4, %s2618_s13 }
 0x273   : > { %v1483_v14 = vsel (%p459_p1), %vm479_vm0, %v1482_v30, %v1428_v41 }
 0x274   : > { %v1485_v48 = vsel (%p459_p1), %vm482_vm1, %v1484_v45, %v1483_v14 }
 0x275   : > { %v1487_v49 = vsel (%p459_p1), %vm485_vm2, %v1486_v47, %v1485_v48 }
 0x276   : >> { %1258 = vxpose.xlu0.b32.end [4/4] (short) (narrow) %v1250_v60, 8 }
 0x2ae   : >> { %v1323_v38 = vpop.permute.xlu1 %1322 }
 0x2af   : >> { %1334 = vxpose.xlu1.b32.start [1/4] (short) (narrow) %v1323_v38, 8 }
 0x2b2   : >> { %v1327_v57 = vpop.permute.xlu1 %1326 }
 0x2ba   : >> { %v1325_v46 = vpop.permute.xlu0 %1324 }
 0x2bb   : >> { %1335 = vxpose.xlu1.b32.cont [2/4] (short) (narrow) %v1325_v46, 8 }
 0x2be   : >> { %v1329_v61 = vpop.permute.xlu0 %1328 }
 0x2bf   : >> { %1336 = vxpose.xlu1.b32.cont [3/4] (short) (narrow) %v1327_v57, 8 }
 0x2c3   : >> { %1337 = vxpose.xlu1.b32.end [4/4] (short) (narrow) %v1329_v61, 8 }
 0x2e6   : >> { %v1271_v62 = vpop.trf.xlu0 }
 0x2e7   : >> { %v1294_v63 = vrot.slane %v1271_v62, %v3092_v8 }
 0x2e9   : >> { %v1295_v0 = vcombine.high %v1294_v63, %v1294_v63  ;;  %v1302_v2 = vrot.slane %v1294_v63, %v3092_v8 }
 0x2eb   : >> { %v1309_v3 = vrot.slane %v1295_v0, %v3092_v8  ;;  %v1310_v4 = vcombine.high %v1302_v2, %v1302_v2  ;;  %1318 = vst.msk [vmem:[%s3216_s8] sm:$0x1] %vm1317_vm7, %v1302_v2 }
 0x2ed   : >> { %v1311_v5 = vcombine.high %v1309_v3, %v1309_v3  ;;  %1319 = vst.msk [vmem:[%s3216_s8 + $0x10] sm:$0x1] %vm1317_vm7, %v1309_v3  ;;  %1320 = vst.msk [vmem:[%s3216_s8 + $0x20] sm:$0x1] %vm1317_vm7, %v1310_v4 }
 0x2ef   : >> { %1321 = vst.msk [vmem:[%s3216_s8 + $0x30] sm:$0x1] %vm1317_vm7, %v1311_v5 }
 0x333   : >> { %v1350_v6 = vpop.trf.xlu1 }
 0x334   : >> { %v1373_v7 = vrot.slane %v1350_v6, %v3092_v8 }
 0x336   : >> { %v1374_v9 = vcombine.high %v1373_v7, %v1373_v7  ;;  %v1381_v10 = vrot.slane %v1373_v7, %v3092_v8 }
 0x338   : >> { %v1388_v11 = vrot.slane %v1374_v9, %v3092_v8  ;;  %v1394_v17 = vrot.slane %v1381_v10, %v3097_v18  ;;  %v1389_v22 = vcombine.high %v1381_v10, %v1381_v10 }
 0x33a   : >> { %1407 = vrot.lane.b32.xlu0 %v1394_v17, %s2902_s9  ;;  %v1398_v24 = vrot.slane %v1388_v11, %v3097_v18  ;;  %v1390_v25 = vcombine.high %v1388_v11, %v1388_v11  ;;  %v1402_v27 = vrot.slane %v1389_v22, %v3097_v18 }
 0x33c   : >> { %1409 = vrot.lane.b32.xlu1 %v1398_v24, %s2902_s9  ;;  %v1406_v26 = vrot.slane %v1390_v25, %v3097_v18 }
 0x33e   : >> { %1413 = vrot.lane.b32.xlu0 %v1406_v26, %s2902_s9 }
 0x340   : >> { %1411 = vrot.lane.b32.xlu1 %v1402_v27, %s2902_s9 }
 0x35c   : > { %1446 = vxpose.xlu0.b32.start.end [1/1] (short) (narrow) (%p459_p1), %v1444_v13, 24 }
 0x365   : > { %1489 = vxpose.xlu0.b32.start.end [1/1] (short) (narrow) (%p459_p1), %v1487_v49, 24 }
 0x3ac   : >> { %v1408_v29 = vpop.permute.xlu0 %1407 }
 0x3ad   : >> { %1420 = vst.msk [vmem:[%s3216_s8] sm:$0x1] %vm1419_vm8, %v1408_v29 }
 0x3ae   : >> { %v1410_v23 = vpop.permute.xlu1 %1409 }
 0x3af   : >> { %1421 = vst.msk [vmem:[%s3216_s8 + $0x10] sm:$0x1] %vm1419_vm8, %v1410_v23  ;;  %461 = sbr.rel (!%p459_p1) target bundleno = 50 (0x32), region = 217 }
 0x3b0   : >> { %v1414_v31 = vpop.permute.xlu0 %1413 }
 0x3b1   : >> { %1423 = vst.msk [vmem:[%s3216_s8 + $0x30] sm:$0x1] %vm1419_vm8, %v1414_v31 }
 0x3b2   : >> { %v1412_v20 = vpop.permute.xlu1 %1411 }
 0x3b3   : >> { %1422 = vst.msk [vmem:[%s3216_s8 + $0x20] sm:$0x1] %vm1419_vm8, %v1412_v20 }
 0x3d8   : > { %v1462_v50 = vpop.trf.xlu0 }
 0x3d9   : > { %2671 = vmatprep.mubr.msk.f32.mxu1 %vm572_vm4, %v1462_v50  ;;  %v1525_v51 = vrot.slane %v1462_v50, 1 }
 0x3dc   : > { %v1463_v52 = vpop.trf.xlu0 }
 0x3dd   : > { %2672 = vmatmul.mubr.msk.f32.vlgmr.msra.gmra.mxu1 %vm572_vm4, %v1463_v52  ;;  %v1526_v54 = vrot.slane %v1463_v52, 1 }
 0x3de   : > { %2680 = vmatpush3.msk.msra.mxu1 %vm577_vm3, %v3039_v16 }
 0x3df   : > { %v1527_v21 = vsel %vm566_vm5, %v1525_v51, %v1526_v54 }
 0x3e0   : > { %2666 = vmatprep.mubr.msk.f32.mxu0 %vm572_vm4, %v1527_v21  ;;  %v1464_v56 = vpop.trf.xlu0 }
 0x3e1   : > { %v1528_v58 = vrot.slane %v1464_v56, 1 }
 0x3e3   : > { %v1529_v44 = vsel %vm566_vm5, %v1526_v54, %v1528_v58 }
 0x3e4   : > { %2667 = vmatmul.mubr.msk.f32.vlgmr.msra.gmra.mxu0 %vm572_vm4, %v1529_v44  ;;  %v1505_v59 = vpop.trf.xlu0 }
 0x3e5   : > { %2676 = vmatprep.mubr.msk.f32.mxu0 %vm572_vm4, %v1505_v59  ;;  %2675 = vmatpush3.msk.msra.mxu0 %vm577_vm3, %v3034_v15  ;;  %v1783_v55 = vrot.slane %v1505_v59, 1 }
 0x3e8   : > { %v1506_v53 = vpop.trf.xlu0 }
 0x3e9   : > { %v1784_v60 = vrot.slane %v1506_v53, 1  ;;  %2677 = vmatmul.mubr.msk.f32.vlgmr.msra.gmra.mxu0 %vm572_vm4, %v1506_v53 }
 0x3eb   : > { %v1785_v16 = vsel %vm566_vm5, %v1783_v55, %v1784_v60 }
 0x3ec   : > { %2681 = vmatprep.mubr.msk.f32.mxu1 %vm572_vm4, %v1785_v16  ;;  %v1507_v38 = vpop.trf.xlu0 }
 0x3ed   : > { %v1786_v46 = vrot.slane %v1507_v38, 1 }
 0x3ef   : > { %v1787_v57 = vsel %vm566_vm5, %v1784_v60, %v1786_v46 }
 0x3f0   : > { %2682 = vmatmul.mubr.msk.f32.vlgmr.msra.gmra.mxu1 %vm572_vm4, %v1787_v57 }
 0x49d   : > { %v2673_v63 = vpop.f32.mrf.mxu1 }
 0x49f   : > { %v1687_v15 = vpop.f32.mrf.mxu1 }
 0x4a4   : > { %v2668_v61 = vpop.f32.mrf.mxu0 }
 0x4a5   : > { %v1693_v9 = vadd.f32 %v2673_v63, %v2668_v61 }
 0x4a6   : > { %v1605_v62 = vpop.f32.mrf.mxu0 }
 0x4a7   : > { %v1688_v3 = vadd.f32 %v1687_v15, %v1605_v62 }
 0x4a9   : > { %v2678_v0 = vpop.f32.mrf.mxu0 }
 0x4aa   : > { %v1781_v11 = vadd.f32 %v2678_v0, %v1693_v9 }
 0x4ab   : > { %v1771_v2 = vpop.f32.mrf.mxu0 }
 0x4ac   : > { %v1780_v5 = vadd.f32 %v1771_v2, %v1688_v3 }
 0x4b0   : > { %v2683_v4 = vpop.f32.mrf.mxu1 }
 0x4b1   : > { %v1871_v22 = vadd.f32 %v2683_v4, %v1781_v11 }
 0x4b2   : > { %v1861_v6 = vpop.f32.mrf.mxu1 }
 0x4b3   : > { %v1870_v7 = vadd.f32 %v1861_v6, %v1780_v5  ;;  %v1879_v23 = vadd.f32 %v3017_v12, %v1871_v22 }
 0x4b5   : > { %v1878_v10 = vadd.f32 %v3017_v12, %v1870_v7  ;;  %v1938_v1 = vrot.slane %v1879_v23, %v3092_v8  ;;  %v1931_v39 = vcombine.high %v1879_v23, %v1879_v23 }
 0x4b7   : > { %v1882_v17 = vcombine.high %v1878_v10, %v1878_v10  ;;  %v1889_v24 = vrot.slane %v1878_v10, %v3092_v8  ;;  %v1946_v35 = vcombine.high %v1938_v1, %v1938_v1  ;;  %v3314_v36 = vrot.slane %v1938_v1, %v3092_v8 }
 0x4b8   : > { %v1945_v40 = vrot.slane %v1931_v39, %v3092_v8 }
 0x4b9   : > { %v1896_v25 = vrot.slane %v1882_v17, %v3092_v8  ;;  %v1897_v26 = vcombine.high %v1889_v24, %v1889_v24  ;;  %v3292_v27 = vrot.slane %v1889_v24, %v3092_v8  ;;  %v1968_v33 = vrot.slane %v1946_v35, %v3092_v8 }
 0x4ba   : > { %v2031_v37 = vrot.slane %v3314_v36, %v3097_v18  ;;  %v1976_v30 = vcombine.high %v3314_v36, %v3314_v36  ;;  %v3328_v42 = vrot.slane %v1945_v40, %v3092_v8  ;;  %v1947_v43 = vcombine.high %v1945_v40, %v1945_v40 }
 0x4bb   : > { %v3295_v29 = vrot.slane %v1896_v25, %v3092_v8  ;;  %v3299_v31 = vrot.slane %v1897_v26, %v3092_v8  ;;  %v1999_v20 = vrot.slane %v3292_v27, %v3097_v18  ;;  %v1927_v12 = vcombine.high %v3292_v27, %v3292_v27 }
 0x4bc   : > { %v2035_v41 = vrot.slane %v1968_v33, %v3097_v18  ;;  %v2039_v13 = vrot.slane %v1976_v30, %v3097_v18  ;;  %v2047_v45 = vrot.slane %v3328_v42, %v3097_v18  ;;  %v1978_v14 = vcombine.high %v1968_v33, %v1968_v33 }
 0x4bd   : > { %v2015_v32 = vrot.slane %v3295_v29, %v3097_v18  ;;  %2060 = vrot.lane.b32.xlu1 %v1999_v20, %s2903_s10  ;;  %v2003_v34 = vrot.slane %v3299_v31, %v3097_v18  ;;  %v2007_v28 = vrot.slane %v1927_v12, %v3097_v18  ;;  %v3336_v47 = vrot.slane %v1947_v43, %v3092_v8 }
 0x4be   : > { %v2043_v48 = vrot.slane %v1978_v14, %v3097_v18  ;;  %v3344_v50 = vcombine.high %v3328_v42, %v3328_v42  ;;  %v1898_v52 = vcombine.high %v1896_v25, %v1896_v25  ;;  %v1929_v54 = vcombine.high %v3299_v31, %v3299_v31 }
 0x4bf   : > { %2068 = vrot.lane.b32.xlu0 %v2015_v32, %s2903_s10  ;;  %v2051_v49 = vrot.slane %v3336_v47, %v3097_v18  ;;  %v1928_v44 = vcombine.high %v3295_v29, %v3295_v29  ;;  %v1979_v60 = vcombine.high %v3336_v47, %v3336_v47 }
 0x4c0   : > { %v2055_v51 = vrot.slane %v3344_v50, %v3097_v18  ;;  %v1926_v21 = vrot.slane %v1898_v52, %v3092_v8  ;;  %v2011_v56 = vrot.slane %v1929_v54, %v3097_v18 }
 0x4c1   : > { %2062 = vrot.lane.b32.xlu1 %v2003_v34, %s2903_s10  ;;  %v2023_v59 = vrot.slane %v1928_v44, %v3097_v18  ;;  %v2059_v16 = vrot.slane %v1979_v60, %v3097_v18 }
 0x4c2   : > { %v2019_v58 = vrot.slane %v1926_v21, %v3097_v18  ;;  %v1930_v53 = vcombine.high %v1926_v21, %v1926_v21 }
 0x4c4   : > { %v2027_v55 = vrot.slane %v1930_v53, %v3097_v18 }
 0x4c5   : > { %2064 = vrot.lane.b32.xlu1 %v2007_v28, %s2903_s10 }
 0x4c9   : > { %2076 = vrot.lane.b32.xlu1 %v2031_v37, %s2903_s10 }
 0x4cd   : > { %2078 = vrot.lane.b32.xlu1 %v2035_v41, %s2903_s10 }
 0x4d1   : > { %2080 = vrot.lane.b32.xlu1 %v2039_v13, %s2903_s10 }
 0x4d5   : > { %2084 = vrot.lane.b32.xlu1 %v2047_v45, %s2903_s10 }
 0x4d9   : > { %2082 = vrot.lane.b32.xlu1 %v2043_v48, %s2903_s10 }
 0x4dd   : > { %2086 = vrot.lane.b32.xlu1 %v2051_v49, %s2903_s10 }
 0x4e1   : > { %2088 = vrot.lane.b32.xlu1 %v2055_v51, %s2903_s10 }
 0x4e5   : > { %2066 = vrot.lane.b32.xlu1 %v2011_v56, %s2903_s10 }
 0x4e9   : > { %2070 = vrot.lane.b32.xlu1 %v2019_v58, %s2903_s10 }
 0x4ed   : > { %2072 = vrot.lane.b32.xlu1 %v2023_v59, %s2903_s10 }
 0x4f1   : > { %2074 = vrot.lane.b32.xlu1 %v2027_v55, %s2903_s10 }
 0x4f5   : > { %2090 = vrot.lane.b32.xlu1 %v2059_v16, %s2903_s10 }
 0x52f   : > { %v2061_v38 = vpop.permute.xlu1 %2060 }
 0x530   : > { %v2109_v5 = vsel %vm1150_vm6, %v3292_v27, %v2061_v38 }
 0x531   : > { %v2069_v34 = vpop.permute.xlu0 %2068 }
 0x533   : > { %v2063_v46 = vpop.permute.xlu1 %2062 }
 0x534   : > { %v2110_v4 = vsel %vm1150_vm6, %v3299_v31, %v2063_v46 }
 0x535   : > { %v2141_v7 = vcombine.low %v2109_v5, %v2110_v4 }
 0x537   : > { %v2065_v57 = vpop.permute.xlu1 %2064  ;;  %v2149_v23 = vrot.slane %v2141_v7, %v3184_v19 }
 0x538   : > { %v2111_v10 = vsel %vm1150_vm6, %v1927_v12, %v2065_v57 }
 0x53b   : > { %v2077_v61 = vpop.permute.xlu1 %2076 }
 0x53c   : > { %v2117_v26 = vsel %vm1150_vm6, %v3314_v36, %v2077_v61  ;;  %v2113_v36 = vsel %vm1150_vm6, %v3295_v29, %v2069_v34 }
 0x53f   : > { %v2079_v62 = vpop.permute.xlu1 %2078 }
 0x540   : > { %v2118_v11 = vsel %vm1150_vm6, %v1968_v33, %v2079_v62 }
 0x541   : > { %v2175_v27 = vcombine.low %v2117_v26, %v2118_v11 }
 0x543   : > { %v2081_v63 = vpop.permute.xlu1 %2080  ;;  %v2183_v12 = vrot.slane %v2175_v27, %v3184_v19 }
 0x544   : > { %v2119_v17 = vsel %vm1150_vm6, %v1976_v30, %v2081_v63 }
 0x547   : > { %v2085_v0 = vpop.permute.xlu1 %2084 }
 0x548   : > { %v2121_v43 = vsel %vm1150_vm6, %v3328_v42, %v2085_v0 }
 0x54b   : > { %v2083_v15 = vpop.permute.xlu1 %2082 }
 0x54c   : > { %v2120_v6 = vsel %vm1150_vm6, %v1978_v14, %v2083_v15 }
 0x54d   : > { %v2176_v24 = vcombine.low %v2119_v17, %v2120_v6 }
 0x54f   : > { %v2087_v2 = vpop.permute.xlu1 %2086  ;;  %v2190_v32 = vrot.slane %v2176_v24, %v3184_v19 }
 0x550   : > { %v2122_v40 = vsel %vm1150_vm6, %v3336_v47, %v2087_v2 }
 0x551   : > { %v2191_v39 = vcombine.low %v2183_v12, %v2190_v32  ;;  %v2192_v45 = vcombine.low %v2121_v43, %v2122_v40 }
 0x553   : > { %v2089_v3 = vpop.permute.xlu1 %2088 }
 0x554   : > { %v2123_v49 = vsel %vm1150_vm6, %v3344_v50, %v2089_v3 }
 0x557   : > { %v2067_v9 = vpop.permute.xlu1 %2066 }
 0x558   : > { %v2112_v22 = vsel %vm1150_vm6, %v1929_v54, %v2067_v9  ;;  %v2200_v54 = vrot.slane %v2192_v45, %v3184_v19 }
 0x559   : > { %v2142_v25 = vcombine.low %v2111_v10, %v2112_v22 }
 0x55b   : > { %v2156_v31 = vrot.slane %v2142_v25, %v3184_v19  ;;  %v2071_v20 = vpop.permute.xlu1 %2070 }
 0x55c   : > { %v2114_v28 = vsel %vm1150_vm6, %v1926_v21, %v2071_v20 }
 0x55d   : > { %v2157_v1 = vcombine.low %v2149_v23, %v2156_v31  ;;  %v2158_v33 = vcombine.low %v2113_v36, %v2114_v28 }
 0x55f   : > { %v2073_v35 = vpop.permute.xlu1 %2072  ;;  %2279 = vrot.lane.b32.xlu1 %v2157_v1, %s2904_s11  ;;  %v2166_v14 = vrot.slane %v2158_v33, %v3184_v19 }
 0x560   : > { %v2115_v41 = vsel %vm1150_vm6, %v1928_v44, %v2073_v35 }
 0x563   : > { %2283 = vrot.lane.b32.xlu1 %v2191_v39, %s2904_s11  ;;  %v2075_v37 = vpop.permute.xlu1 %2074 }
 0x564   : > { %v2116_v30 = vsel %vm1150_vm6, %v1930_v53, %v2075_v37 }
 0x565   : > { %v2159_v13 = vcombine.low %v2115_v41, %v2116_v30 }
 0x567   : > { %v2173_v48 = vrot.slane %v2159_v13, %v3184_v19  ;;  %v2091_v29 = vpop.permute.xlu1 %2090 }
 0x568   : > { %v2124_v52 = vsel %vm1150_vm6, %v1979_v60, %v2091_v29 }
 0x569   : > { %v2193_v47 = vcombine.low %v2123_v49, %v2124_v52  ;;  %v2174_v51 = vcombine.low %v2166_v14, %v2173_v48 }
 0x56b   : > { %v2207_v21 = vrot.slane %v2193_v47, %v3184_v19  ;;  %2281 = vrot.lane.b32.xlu0 %v2174_v51, %s2904_s11 }
 0x56d   : > { %v2208_v56 = vcombine.low %v2200_v54, %v2207_v21 }
 0x56f   : > { %2285 = vrot.lane.b32.xlu0 %v2208_v56, %s2904_s11 }
 0x58d   : > { %2213 = vxpose.xlu0.b32.start [1/4] (short) (narrow) %v2157_v1, 8 }
 0x591   : > { %2214 = vxpose.xlu0.b32.cont [2/4] (short) (narrow) %v2174_v51, 8 }
 0x595   : > { %2215 = vxpose.xlu0.b32.cont [3/4] (short) (narrow) %v2191_v39, 8 }
 0x599   : > { %2216 = vxpose.xlu0.b32.end [4/4] (short) (narrow) %v2208_v56, 8 }
 0x5d1   : > { %v2280_v42 = vpop.permute.xlu1 %2279 }
 0x5d2   : > { %2291 = vxpose.xlu1.b32.start [1/4] (short) (narrow) %v2280_v42, 8 }
 0x5d5   : > { %v2284_v58 = vpop.permute.xlu1 %2283 }
 0x5dd   : > { %v2282_v50 = vpop.permute.xlu0 %2281 }
 0x5de   : > { %2292 = vxpose.xlu1.b32.cont [2/4] (short) (narrow) %v2282_v50, 8 }
 0x5e1   : > { %v2286_v44 = vpop.permute.xlu0 %2285 }
 0x5e2   : > { %2293 = vxpose.xlu1.b32.cont [3/4] (short) (narrow) %v2284_v58, 8 }
 0x5e6   : > { %2294 = vxpose.xlu1.b32.end [4/4] (short) (narrow) %v2286_v44, 8 }
 0x609   : > { %v2229_v19 = vpop.trf.xlu0 }
 0x60a   : > { %v2252_v59 = vrot.slane %v2229_v19, %v3092_v8 }
 0x60c   : > { %v2253_v53 = vcombine.high %v2252_v59, %v2252_v59  ;;  %v2260_v55 = vrot.slane %v2252_v59, %v3092_v8 }
 0x60e   : > { %v2267_v60 = vrot.slane %v2253_v53, %v3092_v8  ;;  %2275 = vst.msk [vmem:[%s3045_s27 + $0xf] sm:$0x1] %vm1317_vm7, %v2260_v55  ;;  %v2268_v38 = vcombine.high %v2260_v55, %v2260_v55 }
 0x610   : > { %2276 = vst.msk [vmem:[%s3045_s27 + $0x1f] sm:$0x1] %vm1317_vm7, %v2267_v60  ;;  %v2269_v16 = vcombine.high %v2267_v60, %v2267_v60  ;;  %2277 = vst.msk [vmem:[%s3045_s27 + $0x2f] sm:$0x1] %vm1317_vm7, %v2268_v38 }
 0x612   : > { %2278 = vst.msk [vmem:[%s3045_s27 + $0x3f] sm:$0x1] %vm1317_vm7, %v2269_v16 }
 0x656   : > { %v2307_v46 = vpop.trf.xlu1 }
 0x657   : > { %v2330_v57 = vrot.slane %v2307_v46, %v3092_v8 }
 0x659   : > { %v2331_v61 = vcombine.high %v2330_v57, %v2330_v57  ;;  %v2338_v62 = vrot.slane %v2330_v57, %v3092_v8 }
 0x65b   : > { %v2345_v63 = vrot.slane %v2331_v61, %v3092_v8  ;;  %v2351_v0 = vrot.slane %v2338_v62, %v3097_v18  ;;  %v2346_v3 = vcombine.high %v2338_v62, %v2338_v62 }
 0x65d   : > { %2364 = vrot.lane.b32.xlu0 %v2351_v0, %s2905_s12  ;;  %v2355_v15 = vrot.slane %v2345_v63, %v3097_v18  ;;  %v2347_v2 = vcombine.high %v2345_v63, %v2345_v63  ;;  %v2359_v5 = vrot.slane %v2346_v3, %v3097_v18 }
 0x65f   : > { %2366 = vrot.lane.b32.xlu1 %v2355_v15, %s2905_s12  ;;  %v2363_v4 = vrot.slane %v2347_v2, %v3097_v18 }
 0x661   : > { %2370 = vrot.lane.b32.xlu0 %v2363_v4, %s2905_s12 }
 0x663   : > { %2368 = vrot.lane.b32.xlu1 %v2359_v5, %s2905_s12 }
 0x6cf   : > { %v2365_v8 = vpop.permute.xlu0 %2364 }
 0x6d0   : > { %2377 = vst.msk [vmem:[%s3045_s27 + $0xf] sm:$0x1] %vm1419_vm8, %v2365_v8 }
 0x6d1   : > { %v2367_v6 = vpop.permute.xlu1 %2366 }
 0x6d2   : > { %2378 = vst.msk [vmem:[%s3045_s27 + $0x1f] sm:$0x1] %vm1419_vm8, %v2367_v6 }
 0x6d3   : > { %v2371_v7 = vpop.permute.xlu0 %2370 }
 0x6d4   : > { %2380 = vst.msk [vmem:[%s3045_s27 + $0x3f] sm:$0x1] %vm1419_vm8, %v2371_v7 }
 0x6d5   : > { %v2369_v18 = vpop.permute.xlu1 %2368 }
 0x6d6   : > { %2379 = vst.msk [vmem:[%s3045_s27 + $0x2f] sm:$0x1] %vm1419_vm8, %v2369_v18 }
 0x6d7   : > { %2805 = shalt.err (!%p2802_p11)
}
 0x6d8   : > { %s2806_s27 = scalar_lea.hbm %s3425_s24, 1024  ;;  %s2810_s10 = scalar_lea.hbm %s3483_s4, 2048 }
 0x6d9   : > { %p2807_p12 = scmp.ne.s32.totalorder %s3425_s24, %s2806_s27  ;;  %p2811_p1 = scmp.lt.s32.totalorder %s3425_s24, %s3483_s4 }
 0x6da   : > { %p2812_p2 = scmp.lt.s32.totalorder %s2810_s10, %s2806_s27 }
 0x6db   : > { %p2808_p13 = pnand %p2807_p12, %p2977_p5 }
 0x6dc   : > { %p2813_p3 = por %p2812_p2, %p2811_p1 }
 0x6dd   : > { %p2809_p0 = pneg %p2808_p13 }
 0x6df   : > { %p2814_p4 = pnand %p2813_p3, %p2809_p0 }
 0x6e1   : > { %2817 = shalt.err (!%p2814_p4)
}
 0x6e2   : > { %s2907_s13 = smov 128   ;;  %s2908_s21 = smov 8  }
 0x6e3   : > { %2685 = dma.vmem_to_hbm [thread:$0]  (%p2977_p5), %s3427_s14, 1024, %s3425_s24, %s2382_s18, %s2907_s13, %s2907_s13, %s2908_s21  }
 0x6e4 PF: > { %s2412_s22 = sand.u32 1, %s2868_s15   ;;  %p2688_p6 = pnand %p2561_p10, %p2988_p9 }
 0x6e5   : > { %s2413_s30 = scalar_lea.sflag [#allocation5], %s2412_s22 }
 0x6e6   : > { %p2689_p7 = pneg %p2688_p6 }
 0x6e8   : > { %2863 = dma.done.wait (%p2689_p7), %s2413_s30, 1024  }
 0x6e9   : > { %2865 = vsyncadd (%p2689_p7), %s2413_s30, 4294966272  ;;  %s17_s20 = sadd.s32 1, %s2888_s20   ;;  %s3487_s15 = smov %s2872_s16 }
 0x6ea   : > { %p14_p8 = scmp.ge.s32.totalorder %s17_s20, 4   ;;  %s3488_s16 = smov %s2876_s17 }
 0x6eb   : > { %s3489_s17 = smov %s2986_s28  ;;  %s3490_s18 = smov %s2884_s19 }
 0x6ec   : > { %s3491_s19 = smov %s3493_s23  ;;  %16 = sbr.rel (!%p14_p8) target bundleno = 4 (0x4), region = 228 }
 0x6f1   :  { %2418 = vsyncpa [#allocation5], 1 }
 0x6f2   :  { %2420 = vsyncpa [#allocation5 + $0x1], 1 }

</bundles_post_ra>
